<compile_context>
chip_gen: v5e
topology: v5e:2x2
jax: 0.10.0
libtpu: 0.0.40
codegen_flags: <defaults>
</compile_context>

<pallas_src>
import functools

import jax
import jax.numpy as jnp
from jax.experimental import pallas as pl
from jax.experimental.pallas import tpu as pltpu

LANES = 128
MAX_TILE_ROWS = 4096          # 4096 * 128 * 4 B = 2 MiB per input block
MAX_SLICES = 2                # leading "parallel" axis (2 TCs on v7x)
PAD_MULTIPLE = 8 * LANES      # keep row count a multiple of 8


def _mse_partial_kernel(x_ref, y_ref, o_ref, acc_ref, *,
                        tile_rows, rows, blocks_per_slice, needs_mask):
    s = pl.program_id(0)   # slice (parallel across cores)
    t = pl.program_id(1)   # tile within slice (sequential reduction)

    # Zero the per-slice accumulator at the start of each slice's loop.
    @pl.when(t == 0)
    def _():
        acc_ref[...] = jnp.zeros_like(acc_ref)

    d = x_ref[...].astype(jnp.float32) - y_ref[...].astype(jnp.float32)
    sq = d * d

    if needs_mask:
        # Rows past the end of the array: out-of-range grid steps re-read the
        # last valid block (clamped index_map) but their mask is all-false,
        # and the partial boundary block's garbage rows are zeroed here too.
        row_start = (s * blocks_per_slice + t) * tile_rows
        row_idx = row_start + jax.lax.broadcasted_iota(
            jnp.int32, (tile_rows, LANES), 0)
        sq = jnp.where(row_idx < rows, sq, 0.0)

    # Lane-parallel accumulation (VPU/XLU); only a sublane reduce per step.
    acc_ref[...] += jnp.sum(sq, axis=0, keepdims=True)

    # Emit this slice's lane-dense partial sum on its last step.
    @pl.when(t == pl.num_programs(1) - 1)
    def _():
        o_ref[...] = acc_ref[...]


@jax.jit
def mse_loss(x, y):
    assert x.shape == y.shape, "input and target must have the same shape"
    n = x.size

    xf = x.reshape(-1)
    yf = y.reshape(-1)

    # Pad only when needed (pure reshape otherwise, no extra HBM copy).
    # Both tensors are padded with the same value (0), so padded positions
    # contribute (0 - 0)^2 = 0 to the sum.
    rem = n % PAD_MULTIPLE
    if rem:
        pad = PAD_MULTIPLE - rem
        xf = jnp.pad(xf, (0, pad))
        yf = jnp.pad(yf, (0, pad))

    rows = xf.size // LANES                 # multiple of 8
    x2d = xf.reshape(rows, LANES)
    y2d = yf.reshape(rows, LANES)

    tile_rows = min(MAX_TILE_ROWS, rows)    # multiple of 8
    nblocks = pl.cdiv(rows, tile_rows)
    num_slices = min(MAX_SLICES, nblocks)   # don't spawn empty slices
    bps = pl.cdiv(nblocks, num_slices)      # tiles per slice

    # Mask / clamp only when some grid step would read past the data.
    needs_mask = (rows % tile_rows != 0) or (bps * num_slices != nblocks)

    kernel = functools.partial(
        _mse_partial_kernel,
        tile_rows=tile_rows, rows=rows,
        blocks_per_slice=bps, needs_mask=needs_mask)

    if needs_mask:
        def in_map(s, t):
            # Clamp so excess steps re-read valid data (masked to 0 in-kernel).
            return (jnp.minimum(s * bps + t, nblocks - 1), 0)
    else:
        def in_map(s, t):
            return (s * bps + t, 0)

    partials = pl.pallas_call(
        kernel,
        out_shape=jax.ShapeDtypeStruct((1, num_slices * LANES), jnp.float32),
        grid_spec=pltpu.PrefetchScalarGridSpec(
            num_scalar_prefetch=0,
            grid=(num_slices, bps),
            in_specs=[
                pl.BlockSpec((tile_rows, LANES), in_map),
                pl.BlockSpec((tile_rows, LANES), in_map),
            ],
            out_specs=pl.BlockSpec((1, LANES), lambda s, t: (0, s)),
            scratch_shapes=[pltpu.VMEM((1, LANES), jnp.float32)],
        ),
        compiler_params=pltpu.CompilerParams(
            dimension_semantics=("parallel", "arbitrary"),
            vmem_limit_bytes=32 << 20,
        ),
    )(x2d, y2d)

    # Final cross-lane collapse + mean reduction (nn.MSELoss default).
    return jnp.sum(partials) / jnp.float32(n)


if __name__ == "__main__":
    key = jax.random.PRNGKey(0)
    k1, k2 = jax.random.split(key)
    # Small NCHW-like shapes (like the PyTorch module's typical use).
    x = jax.random.normal(k1, (2, 4, 16, 16), dtype=jnp.float32)
    t = jax.random.normal(k2, (2, 4, 16, 16), dtype=jnp.float32)

    out = mse_loss(x, t)
    jax.block_until_ready(out)

    # Sanity check against plain-JAX reference.
    ref = jnp.mean((x - t) ** 2)
    assert jnp.allclose(out, ref, rtol=1e-5, atol=1e-6), (out, ref)

    print("KERNEL_OK")
</pallas_src>

<mosaic_0001>
module attributes {stable_mosaic.version = 11 : i64} {
  func.func @_mse_partial_kernel(%arg0: i32, %arg1: i32, %arg2: memref<16x128xf32, #tpu.memory_space<vmem>>, %arg3: memref<16x128xf32, #tpu.memory_space<vmem>>, %arg4: memref<1x128xf32, #tpu.memory_space<vmem>>, %arg5: memref<1x128xf32, #tpu.memory_space<vmem>>) attributes {dimension_semantics = [#tpu.dimension_semantics<parallel>, #tpu.dimension_semantics<arbitrary>], iteration_bounds = array<i64: 1, 1>, scalar_prefetch = 0 : i64, scratch_operands = 1 : i64, tpu.core_type = #tpu.core_type<tc>, window_params = [{transform_indices = @transform_0, window_bounds = array<i64: 16, 128>}, {transform_indices = @transform_1, window_bounds = array<i64: 16, 128>}, {transform_indices = @transform_2, window_bounds = array<i64: 1, 128>}]} {
    %c0_i32 = arith.constant 0 : i32
    %0 = arith.cmpi eq, %arg1, %c0_i32 : i32
    %1 = arith.extui %0 : i1 to i32
    %c0_i32_0 = arith.constant 0 : i32
    %2 = arith.cmpi ne, %1, %c0_i32_0 : i32
    scf.if %2 {
      %cst_10 = arith.constant 0.000000e+00 : f32
      %15 = vector.broadcast %cst_10 : f32 to vector<1x128xf32>
      %c0_11 = arith.constant 0 : index
      %c0_12 = arith.constant 0 : index
      %16 = vector.load %arg5[%c0_11, %c0_12] : memref<1x128xf32, #tpu.memory_space<vmem>>, vector<1x128xf32>
      tpu.vector_store %arg5[%c0_11, %c0_12], %15 {strides = array<i32>} : memref<1x128xf32, #tpu.memory_space<vmem>>, vector<1x128xf32>,
    } else {
    }
    %c0 = arith.constant 0 : index
    %c0_1 = arith.constant 0 : index
    %3 = vector.load %arg2[%c0, %c0_1] : memref<16x128xf32, #tpu.memory_space<vmem>>, vector<16x128xf32>
    %c0_2 = arith.constant 0 : index
    %c0_3 = arith.constant 0 : index
    %4 = vector.load %arg3[%c0_2, %c0_3] : memref<16x128xf32, #tpu.memory_space<vmem>>, vector<16x128xf32>
    %5 = arith.subf %3, %4 : vector<16x128xf32>
    %6 = arith.mulf %5, %5 : vector<16x128xf32>
    %c0_4 = arith.constant 0 : index
    %c0_5 = arith.constant 0 : index
    %7 = vector.load %arg5[%c0_4, %c0_5] : memref<1x128xf32, #tpu.memory_space<vmem>>, vector<1x128xf32>
    %cst = arith.constant dense<0.000000e+00> : vector<128xf32>
    %8 = vector.multi_reduction <add>, %6, %cst [0] : vector<16x128xf32> to vector<128xf32>
    %9 = vector.shape_cast %8 : vector<128xf32> to vector<1x128xf32>
    %10 = arith.addf %7, %9 : vector<1x128xf32>
    %c0_6 = arith.constant 0 : index
    %c0_7 = arith.constant 0 : index
    %11 = vector.load %arg5[%c0_6, %c0_7] : memref<1x128xf32, #tpu.memory_space<vmem>>, vector<1x128xf32>
    tpu.vector_store %arg5[%c0_6, %c0_7], %10 {strides = array<i32>} : memref<1x128xf32, #tpu.memory_space<vmem>>, vector<1x128xf32>,
    %c0_i32_8 = arith.constant 0 : i32
    %12 = arith.cmpi eq, %arg1, %c0_i32_8 : i32
    %13 = arith.extui %12 : i1 to i32
    %c0_i32_9 = arith.constant 0 : i32
    %14 = arith.cmpi ne, %13, %c0_i32_9 : i32
    scf.if %14 {
      %c0_10 = arith.constant 0 : index
      %c0_11 = arith.constant 0 : index
      %15 = vector.load %arg5[%c0_10, %c0_11] : memref<1x128xf32, #tpu.memory_space<vmem>>, vector<1x128xf32>
      %c0_12 = arith.constant 0 : index
      %c0_13 = arith.constant 0 : index
      %16 = vector.load %arg4[%c0_12, %c0_13] : memref<1x128xf32, #tpu.memory_space<vmem>>, vector<1x128xf32>
      tpu.vector_store %arg4[%c0_12, %c0_13], %15 {strides = array<i32>} : memref<1x128xf32, #tpu.memory_space<vmem>>, vector<1x128xf32>,
    } else {
    }
    return
  }
  func.func @transform_0(%arg0: i32, %arg1: i32) -> (i32, i32) {
    %c1_i32 = arith.constant 1 : i32
    %0 = arith.muli %arg0, %c1_i32 : i32
    %1 = arith.addi %0, %arg1 : i32
    %c0_i32 = arith.constant 0 : i32
    %c0_i32_0 = arith.constant 0 : i32
    return %1, %c0_i32 : i32, i32
  }
  func.func @transform_1(%arg0: i32, %arg1: i32) -> (i32, i32) {
    %c1_i32 = arith.constant 1 : i32
    %0 = arith.muli %arg0, %c1_i32 : i32
    %1 = arith.addi %0, %arg1 : i32
    %c0_i32 = arith.constant 0 : i32
    %c0_i32_0 = arith.constant 0 : i32
    return %1, %c0_i32 : i32, i32
  }
  func.func @transform_2(%arg0: i32, %arg1: i32) -> (i32, i32) {
    %c0_i32 = arith.constant 0 : i32
    %c0_i32_0 = arith.constant 0 : i32
    return %c0_i32, %arg0 : i32, i32
  }
}

</mosaic_0001>

<bundles_post_ra>
// kernel: mse_loss.1
= control target key start
LH: loop header
LB: loop body
LE: loop exit
PB: predicated region body
PF: predicated region fallthrough
CT: control target
= control target key end

     0   :  { %v100_v0 = vmov 0.0   ;;  %s131_s0 = inlined_call_operand.vmem [shape: f32[16,128], index: 0, kind: input, shape index: {}]   ;;  %s132_s1 = inlined_call_operand.vmem [shape: f32[16,128], index: 1, kind: input, shape index: {}]   ;;  %s133_s2 = inlined_call_operand.vmem [shape: f32[1,128], index: 2, kind: output, shape index: {}]  }
   0x1   :  { %59 = vst [vmem:[#allocation2] sm:$0x1] %v100_v0  ;;  %v60_v1 = vld [vmem:[%s131_s0] sm:$0xff]  ;;  %v61_v2 = vld [vmem:[%s131_s0 + $0x8] sm:$0xff] }
   0x2   :  { %v62_v3 = vld [vmem:[%s132_s1] sm:$0xff]  ;;  %v63_v4 = vld [vmem:[%s132_s1 + $0x8] sm:$0xff] }
   0x3   :  { %v64_v5 = vsub.f32 %v60_v1, %v62_v3  ;;  %v65_v6 = vsub.f32 %v61_v2, %v63_v4 }
   0x5   :  { %v66_v7 = vmul.f32 %v64_v5, %v64_v5  ;;  %v67_v8 = vmul.f32 %v65_v6, %v65_v6 }
   0x7   :  { %v69_v9 = vadd.f32 %v67_v8, %v66_v7 }
   0x8   :  { %v68_v15 = vld [vmem:[#allocation2] sm:$0x1] }
   0x9   :  { %v70_v10 = vrot.slane %v69_v9, 4 }
   0xb   :  { %v71_v11 = vadd.f32 %v70_v10, %v69_v9 }
   0xd   :  { %v72_v12 = vrot.slane %v71_v11, 2 }
   0xf   :  { %v73_v13 = vadd.f32 %v72_v12, %v71_v11 }
  0x11   :  { %v74_v14 = vrot.slane %v73_v13, 1 }
  0x13   :  { %v75_v16 = vadd.f32 %v74_v14, %v73_v13 }
  0x15   :  { %v76_v17 = vadd.f32 %v75_v16, %v68_v15 }
  0x17   :  { %77 = vst [vmem:[#allocation2] sm:$0x1] %v76_v17 }
  0x1e   :  { %v81_v18 = vld [vmem:[#allocation2] sm:$0x1] }
  0x1f   :  { %82 = vst [vmem:[%s133_s2] sm:$0x1] %v81_v18 }

</bundles_post_ra>
